<compile_context>
chip_gen: v7x
topology: tpu7x:2x2x1
jax: 0.10.0
libtpu: 0.0.40
codegen_flags: <defaults>
</compile_context>

<pallas_src>
import math
from functools import partial

import jax
import jax.numpy as jnp
from jax.experimental import pallas as pl
from jax.experimental.pallas import tpu as pltpu

EPS = 1e-6          # LayerNorm eps (Annotated-Transformer default)
NEG_INF = -1e9      # mask fill value used by the reference attention()

_CAPS = None        # cached (tile caps, vmem limit) per process


def _hw_caps():
    """Per-generation tile caps and VMEM limit (cached)."""
    global _CAPS
    if _CAPS is None:
        try:
            vmem = int(pltpu.get_tpu_info().vmem_capacity_bytes)
        except Exception:
            vmem = 64 * 1024 * 1024
        # Never request the full physical VMEM (v7x only has 64 MiB/core);
        # leave headroom for double buffers + Mosaic internal scratch.
        limit = min((vmem * 3) // 4, 96 * 1024 * 1024)
        if vmem >= 100 * 1024 * 1024:
            # v5e / v6e: 128 MiB VMEM -> bigger q / token / d_ff tiles to cut
            # KV re-reads and per-grid-step overhead.
            caps = dict(tm=512, tn=512, tk=512, tq=512, tkv=512, tf=1024)
        else:
            # v7x-class (64 MiB VMEM): keep tiles modest, keep parallel extent.
            caps = dict(tm=256, tn=512, tk=512, tq=256, tkv=512, tf=512)
        _CAPS = (caps, limit)
    return _CAPS


def _tile(dim, cap, unit):
    """Largest tile <= cap that divides `dim` (halving down to `unit`);
    falls back to the full dim, which is always a legal block size."""
    if dim <= cap:
        return dim
    t = cap
    while t >= unit:
        if dim % t == 0:
            return t
        t //= 2
    return dim


def _ln_f32(x, a, b):
    """Annotated-Transformer LayerNorm: a*(x-mean)/(std+eps)+b, where std is
    the *unbiased* std (torch.Tensor.std default, divide by d-1)."""
    d = x.shape[-1]
    mean = jnp.mean(x, axis=-1, keepdims=True)
    diff = x - mean
    var = jnp.sum(diff * diff, axis=-1, keepdims=True) * (1.0 / (d - 1))
    return a * diff / (jnp.sqrt(var) + EPS) + b


# --------------------------------------------------------------------------
# Kernels
# --------------------------------------------------------------------------
def _layernorm_kernel(x_ref, a_ref, b_ref, o_ref):
    out = _ln_f32(x_ref[...].astype(jnp.float32),
                  a_ref[...].astype(jnp.float32),
                  b_ref[...].astype(jnp.float32))
    o_ref[...] = out.astype(o_ref.dtype)


def _ln_qkv_kernel(x_ref, a_ref, b_ref, w_ref, bias_ref, q_ref, k_ref, v_ref):
    # Fused pre-norm + QKV projection. x: (tm, D); w: (D, 3D); bias: (1, 3D).
    # LN math in f32, MXU operands in the input dtype, accumulation in f32.
    xn = _ln_f32(x_ref[...].astype(jnp.float32),
                 a_ref[...].astype(jnp.float32),
                 b_ref[...].astype(jnp.float32)).astype(x_ref.dtype)
    acc = jnp.dot(xn, w_ref[...], preferred_element_type=jnp.float32)
    acc = acc + bias_ref[...].astype(jnp.float32)
    d = q_ref.shape[-1]
    q_ref[...] = acc[:, :d].astype(q_ref.dtype)
    k_ref[...] = acc[:, d:2 * d].astype(k_ref.dtype)
    v_ref[...] = acc[:, 2 * d:].astype(v_ref.dtype)


def _flash_attn_kernel(q_ref, k_ref, v_ref, mask_ref, o_ref,
                       m_sc, l_sc, acc_sc, *, num_heads, scale):
    # Flash-style attention over KV blocks with an online softmax.
    # q: (1, tq, D), k/v: (1, tkv, D), mask: (1, 1, tkv), out: (1, tq, D).
    kv = pl.program_id(2)
    h_dim = q_ref.shape[-1] // num_heads

    @pl.when(kv == 0)
    def _():
        m_sc[...] = jnp.full_like(m_sc, -jnp.inf)
        l_sc[...] = jnp.zeros_like(l_sc)
        acc_sc[...] = jnp.zeros_like(acc_sc)

    # Softmax scale folded into q once per tile (tq*D multiplies instead of
    # H*tq*tkv per kv step); operands stay in the input dtype for the MXU.
    q = q_ref[0] * jnp.asarray(scale, dtype=q_ref.dtype)
    k = k_ref[0]
    v = v_ref[0]
    # Additive mask bias: 0 where attend, -1e9 where masked (matches the
    # reference masked_fill + softmax up to underflow of exp(-1e9)).
    bias = (1.0 - mask_ref[0].astype(jnp.float32)) * NEG_INF      # (1, tkv)

    for h in range(num_heads):                    # static unroll over heads
        lo, hi = h * h_dim, (h + 1) * h_dim
        s = jnp.einsum("qd,kd->qk", q[:, lo:hi], k[:, lo:hi],
                       preferred_element_type=jnp.float32)        # (tq, tkv)
        s = s + bias
        m_prev = m_sc[h]
        m_new = jnp.maximum(m_prev, jnp.max(s, axis=-1, keepdims=True))
        alpha = jnp.exp(m_prev - m_new)
        p = jnp.exp(s - m_new)
        l_sc[h] = alpha * l_sc[h] + jnp.sum(p, axis=-1, keepdims=True)
        acc_sc[h] = alpha * acc_sc[h] + jnp.dot(
            p.astype(v.dtype), v[:, lo:hi], preferred_element_type=jnp.float32)
        m_sc[h] = m_new

    @pl.when(kv == pl.num_programs(2) - 1)
    def _():
        # Write each normalized head slab straight into the lane-dense output
        # tile (no H-way concatenate materialization).
        for h in range(num_heads):
            lo, hi = h * h_dim, (h + 1) * h_dim
            inv = pl.reciprocal(l_sc[h], approx=True)
            o_ref[0, :, lo:hi] = (acc_sc[h] * inv).astype(o_ref.dtype)


def _matmul_res_single_kernel(x_ref, w_ref, bias_ref, r_ref, o_ref):
    # Single contraction step: no scratch, no pl.when phases.
    acc = jnp.dot(x_ref[...], w_ref[...], preferred_element_type=jnp.float32)
    out = acc + bias_ref[...].astype(jnp.float32) + r_ref[...].astype(jnp.float32)
    o_ref[...] = out.astype(o_ref.dtype)


def _matmul_res_kernel(x_ref, w_ref, bias_ref, r_ref, o_ref, acc_sc):
    # Tiled matmul with K accumulation; bias + residual folded into finalize.
    k = pl.program_id(2)

    @pl.when(k == 0)
    def _():
        acc_sc[...] = jnp.zeros_like(acc_sc)

    acc_sc[...] += jnp.dot(x_ref[...], w_ref[...],
                           preferred_element_type=jnp.float32)

    @pl.when(k == pl.num_programs(2) - 1)
    def _():
        out = (acc_sc[...] + bias_ref[...].astype(jnp.float32)
               + r_ref[...].astype(jnp.float32))
        o_ref[...] = out.astype(o_ref.dtype)


def _ffn_kernel(x_ref, a_ref, b_ref, w1_ref, b1_ref, w2_ref, b2_ref, *rest,
                fuse_final_ln):
    # Fused pre-norm FFN: out = x + relu(LN(x) @ W1 + b1) @ W2 + b2,
    # tiled over d_ff (grid axis 1); the (tm, d_ff) hidden never leaves VMEM.
    # Optionally applies the final Encoder.norm in the finalize step.
    if fuse_final_ln:
        fa_ref, fb_ref, o_ref, xn_sc, acc_sc = rest
    else:
        o_ref, xn_sc, acc_sc = rest
    f = pl.program_id(1)

    @pl.when(f == 0)
    def _():
        xn = _ln_f32(x_ref[...].astype(jnp.float32),
                     a_ref[...].astype(jnp.float32),
                     b_ref[...].astype(jnp.float32))
        xn_sc[...] = xn.astype(xn_sc.dtype)        # kept in the input dtype
        acc_sc[...] = jnp.zeros_like(acc_sc)

    h = jnp.dot(xn_sc[...], w1_ref[...], preferred_element_type=jnp.float32)
    h = jnp.maximum(h + b1_ref[...].astype(jnp.float32), 0.0)
    acc_sc[...] += jnp.dot(h.astype(w2_ref.dtype), w2_ref[...],
                           preferred_element_type=jnp.float32)

    @pl.when(f == pl.num_programs(1) - 1)
    def _():
        out = (acc_sc[...] + b2_ref[...].astype(jnp.float32)
               + x_ref[...].astype(jnp.float32))
        if fuse_final_ln:
            out = _ln_f32(out, fa_ref[...].astype(jnp.float32),
                          fb_ref[...].astype(jnp.float32))
        o_ref[...] = out.astype(o_ref.dtype)


# --------------------------------------------------------------------------
# Pallas wrappers
# --------------------------------------------------------------------------
def layernorm(x2, a, b):
    M, D = x2.shape
    caps, vlim = _hw_caps()
    tm = _tile(M, caps["tm"], 8)
    return pl.pallas_call(
        _layernorm_kernel,
        out_shape=jax.ShapeDtypeStruct((M, D), x2.dtype),
        grid=(M // tm,),
        in_specs=[pl.BlockSpec((tm, D), lambda i: (i, 0)),
                  pl.BlockSpec((1, D), lambda i: (0, 0)),
                  pl.BlockSpec((1, D), lambda i: (0, 0))],
        out_specs=pl.BlockSpec((tm, D), lambda i: (i, 0)),
        compiler_params=pltpu.CompilerParams(
            dimension_semantics=("parallel",),
            vmem_limit_bytes=vlim),
    )(x2, a.reshape(1, D), b.reshape(1, D))


def ln_qkv(x2, ln_a, ln_b, w_qkv, b_qkv):
    M, D = x2.shape
    N3 = w_qkv.shape[1]
    caps, vlim = _hw_caps()
    tm = _tile(M, caps["tm"], 8)
    shape = jax.ShapeDtypeStruct((M, D), x2.dtype)
    return pl.pallas_call(
        _ln_qkv_kernel,
        out_shape=(shape, shape, shape),
        grid=(M // tm,),
        in_specs=[pl.BlockSpec((tm, D), lambda i: (i, 0)),
                  pl.BlockSpec((1, D), lambda i: (0, 0)),
                  pl.BlockSpec((1, D), lambda i: (0, 0)),
                  pl.BlockSpec((D, N3), lambda i: (0, 0)),
                  pl.BlockSpec((1, N3), lambda i: (0, 0))],
        out_specs=(pl.BlockSpec((tm, D), lambda i: (i, 0)),
                   pl.BlockSpec((tm, D), lambda i: (i, 0)),
                   pl.BlockSpec((tm, D), lambda i: (i, 0))),
        compiler_params=pltpu.CompilerParams(
            dimension_semantics=("parallel",),
            vmem_limit_bytes=vlim),
    )(x2, ln_a.reshape(1, D), ln_b.reshape(1, D), w_qkv, b_qkv.reshape(1, N3))


def flash_attention(q, k, v, mask, num_heads):
    B, S, D = q.shape
    dk = D // num_heads
    caps, vlim = _hw_caps()
    tq = _tile(S, caps["tq"], 8)
    tkv = _tile(S, caps["tkv"], 128)
    kernel = partial(_flash_attn_kernel, num_heads=num_heads,
                     scale=1.0 / math.sqrt(dk))
    return pl.pallas_call(
        kernel,
        out_shape=jax.ShapeDtypeStruct((B, S, D), q.dtype),
        grid=(B, S // tq, S // tkv),
        in_specs=[pl.BlockSpec((1, tq, D), lambda b, qi, ki: (b, qi, 0)),
                  pl.BlockSpec((1, tkv, D), lambda b, qi, ki: (b, ki, 0)),
                  pl.BlockSpec((1, tkv, D), lambda b, qi, ki: (b, ki, 0)),
                  pl.BlockSpec((1, 1, tkv), lambda b, qi, ki: (b, 0, ki))],
        out_specs=pl.BlockSpec((1, tq, D), lambda b, qi, ki: (b, qi, 0)),
        scratch_shapes=[pltpu.VMEM((num_heads, tq, 1), jnp.float32),
                        pltpu.VMEM((num_heads, tq, 1), jnp.float32),
                        pltpu.VMEM((num_heads, tq, dk), jnp.float32)],
        compiler_params=pltpu.CompilerParams(
            dimension_semantics=("parallel", "parallel", "arbitrary"),
            vmem_limit_bytes=vlim),
    )(q, k, v, mask)


def matmul_residual(x2, w, b, residual):
    # out = x2 @ w + b + residual, tiled (M, N[, K]) with f32 accumulation.
    M, K = x2.shape
    N = w.shape[1]
    caps, vlim = _hw_caps()
    tm = _tile(M, caps["tm"], 8)
    tn = _tile(N, caps["tn"], 128)
    tk = _tile(K, caps["tk"], 128)
    if tk == K:
        # Common case (K = d_model fits one tile): skip the scratch round-trip.
        return pl.pallas_call(
            _matmul_res_single_kernel,
            out_shape=jax.ShapeDtypeStruct((M, N), x2.dtype),
            grid=(M // tm, N // tn),
            in_specs=[pl.BlockSpec((tm, K), lambda i, j: (i, 0)),
                      pl.BlockSpec((K, tn), lambda i, j: (0, j)),
                      pl.BlockSpec((1, tn), lambda i, j: (0, j)),
                      pl.BlockSpec((tm, tn), lambda i, j: (i, j))],
            out_specs=pl.BlockSpec((tm, tn), lambda i, j: (i, j)),
            compiler_params=pltpu.CompilerParams(
                dimension_semantics=("parallel", "parallel"),
                vmem_limit_bytes=vlim),
        )(x2, w, b.reshape(1, N), residual)
    return pl.pallas_call(
        _matmul_res_kernel,
        out_shape=jax.ShapeDtypeStruct((M, N), x2.dtype),
        grid=(M // tm, N // tn, K // tk),
        in_specs=[pl.BlockSpec((tm, tk), lambda i, j, k: (i, k)),
                  pl.BlockSpec((tk, tn), lambda i, j, k: (k, j)),
                  pl.BlockSpec((1, tn), lambda i, j, k: (0, j)),
                  pl.BlockSpec((tm, tn), lambda i, j, k: (i, j))],
        out_specs=pl.BlockSpec((tm, tn), lambda i, j, k: (i, j)),
        scratch_shapes=[pltpu.VMEM((tm, tn), jnp.float32)],
        compiler_params=pltpu.CompilerParams(
            dimension_semantics=("parallel", "parallel", "arbitrary"),
            vmem_limit_bytes=vlim),
    )(x2, w, b.reshape(1, N), residual)


def ffn_block(x2, ln_a, ln_b, w1, b1, w2, b2, final_ln=None):
    M, D = x2.shape
    F = w1.shape[1]
    caps, vlim = _hw_caps()
    tm = _tile(M, caps["tm"], 8)
    tf = _tile(F, caps["tf"], 128)
    fuse = final_ln is not None
    in_specs = [pl.BlockSpec((tm, D), lambda i, f: (i, 0)),
                pl.BlockSpec((1, D), lambda i, f: (0, 0)),
                pl.BlockSpec((1, D), lambda i, f: (0, 0)),
                pl.BlockSpec((D, tf), lambda i, f: (0, f)),
                pl.BlockSpec((1, tf), lambda i, f: (0, f)),
                pl.BlockSpec((tf, D), lambda i, f: (f, 0)),
                pl.BlockSpec((1, D), lambda i, f: (0, 0))]
    args = [x2, ln_a.reshape(1, D), ln_b.reshape(1, D), w1, b1.reshape(1, F),
            w2, b2.reshape(1, D)]
    if fuse:
        fa, fb = final_ln
        in_specs += [pl.BlockSpec((1, D), lambda i, f: (0, 0)),
                     pl.BlockSpec((1, D), lambda i, f: (0, 0))]
        args += [fa.reshape(1, D), fb.reshape(1, D)]
    return pl.pallas_call(
        partial(_ffn_kernel, fuse_final_ln=fuse),
        out_shape=jax.ShapeDtypeStruct((M, D), x2.dtype),
        grid=(M // tm, F // tf),
        in_specs=in_specs,
        out_specs=pl.BlockSpec((tm, D), lambda i, f: (i, 0)),
        scratch_shapes=[pltpu.VMEM((tm, D), x2.dtype),
                        pltpu.VMEM((tm, D), jnp.float32)],
        compiler_params=pltpu.CompilerParams(
            dimension_semantics=("parallel", "arbitrary"),
            vmem_limit_bytes=vlim),
    )(*args)


# --------------------------------------------------------------------------
# Encoder forward
# --------------------------------------------------------------------------
def encoder_forward(params, x, mask):
    B, S, D = x.shape
    H = params["num_heads"]
    M = B * S
    x2 = x.reshape(M, D)
    layers = params["layers"]
    n_layers = len(layers)
    for li, lp in enumerate(layers):
        # ---- sublayer 0: x = x + W_o . attention(LN(x)) ------------------
        q, k, v = ln_qkv(x2, lp["ln1_a"], lp["ln1_b"], lp["w_qkv"], lp["b_qkv"])
        ctx = flash_attention(q.reshape(B, S, D), k.reshape(B, S, D),
                              v.reshape(B, S, D), mask, H)
        x2 = matmul_residual(ctx.reshape(M, D), lp["wo"], lp["bo"], x2)
        # ---- sublayer 1: x = x + FFN(LN(x)); Encoder.norm fused into the
        # ---- last layer's finalize -----------------------------------------
        final_ln = ((params["norm_a"], params["norm_b"])
                    if li == n_layers - 1 else None)
        x2 = ffn_block(x2, lp["ln2_a"], lp["ln2_b"],
                       lp["w1"], lp["b1"], lp["w2"], lp["b2"],
                       final_ln=final_ln)
    if n_layers == 0:          # degenerate case: just Encoder.norm
        x2 = layernorm(x2, params["norm_a"], params["norm_b"])
    return x2.reshape(B, S, D)


# --------------------------------------------------------------------------
# Pure-JAX reference (semantics of the PyTorch module, eval mode)
# --------------------------------------------------------------------------
def encoder_reference(params, x, mask):
    B, S, D = x.shape
    H = params["num_heads"]
    dk = D // H

    def ln(t, a, b):
        mean = jnp.mean(t, -1, keepdims=True)
        diff = t - mean
        var = jnp.sum(diff * diff, -1, keepdims=True) / (t.shape[-1] - 1)
        return a * diff / (jnp.sqrt(var) + EPS) + b

    def mha(xn, lp):
        qkv = xn @ lp["w_qkv"] + lp["b_qkv"]
        q, k, v = jnp.split(qkv, 3, axis=-1)
        q = q.reshape(B, S, H, dk).transpose(0, 2, 1, 3)
        k = k.reshape(B, S, H, dk).transpose(0, 2, 1, 3)
        v = v.reshape(B, S, H, dk).transpose(0, 2, 1, 3)
        s = jnp.einsum("bhqd,bhkd->bhqk", q, k) / math.sqrt(dk)
        s = jnp.where(mask[:, :, None, :] == 0, NEG_INF, s)
        p = jax.nn.softmax(s, axis=-1)
        ctx = jnp.einsum("bhqk,bhkd->bhqd", p, v)
        return ctx.transpose(0, 2, 1, 3).reshape(B, S, D)

    for lp in params["layers"]:
        x = x + mha(ln(x, lp["ln1_a"], lp["ln1_b"]), lp) @ lp["wo"] + lp["bo"]
        xn = ln(x, lp["ln2_a"], lp["ln2_b"])
        x = x + jnp.maximum(xn @ lp["w1"] + lp["b1"], 0.0) @ lp["w2"] + lp["b2"]
    return ln(x, params["norm_a"], params["norm_b"])


# --------------------------------------------------------------------------
# Deterministic parameter construction
# --------------------------------------------------------------------------
def make_params(key, N, D, H, d_ff, dtype=jnp.float32):
    layers = []
    s = 0.02
    for n in range(N):
        k = jax.random.fold_in(key, n)
        ks = jax.random.split(k, 16)
        wq = s * jax.random.normal(ks[0], (D, D), dtype)
        wk = s * jax.random.normal(ks[1], (D, D), dtype)
        wv = s * jax.random.normal(ks[2], (D, D), dtype)
        bq = s * jax.random.normal(ks[3], (D,), dtype)
        bk = s * jax.random.normal(ks[4], (D,), dtype)
        bv = s * jax.random.normal(ks[5], (D,), dtype)
        layers.append(dict(
            # Q/K/V projections fused into one (D, 3D) weight / (3D,) bias.
            w_qkv=jnp.concatenate([wq, wk, wv], axis=1),
            b_qkv=jnp.concatenate([bq, bk, bv], axis=0),
            wo=s * jax.random.normal(ks[6], (D, D), dtype),
            bo=s * jax.random.normal(ks[7], (D,), dtype),
            w1=s * jax.random.normal(ks[8], (D, d_ff), dtype),
            b1=s * jax.random.normal(ks[9], (d_ff,), dtype),
            w2=s * jax.random.normal(ks[10], (d_ff, D), dtype),
            b2=s * jax.random.normal(ks[11], (D,), dtype),
            ln1_a=1.0 + s * jax.random.normal(ks[12], (D,), dtype),
            ln1_b=s * jax.random.normal(ks[13], (D,), dtype),
            ln2_a=1.0 + s * jax.random.normal(ks[14], (D,), dtype),
            ln2_b=s * jax.random.normal(ks[15], (D,), dtype),
        ))
    return dict(layers=layers, num_heads=H,
                norm_a=jnp.ones((D,), dtype), norm_b=jnp.zeros((D,), dtype))


if __name__ == "__main__":
    B, S, D, H, d_ff, N = 2, 8, 32, 4, 64, 2

    key = jax.random.PRNGKey(0)
    kx, kp = jax.random.split(key)
    x = jax.random.normal(kx, (B, S, D), jnp.float32)

    # mask: 1 = attend, 0 = masked; batch 1 has its last two key positions masked.
    mask = jnp.ones((B, 1, S), jnp.float32)
    mask = mask.at[1, 0, S - 2:].set(0.0)

    params = make_params(kp, N, D, H, d_ff)

    out = encoder_forward(params, x, mask)
    out = jax.block_until_ready(out)
    assert out.shape == (B, S, D)
    assert bool(jnp.all(jnp.isfinite(out)))

    # correctness check against a pure-JAX reference of the same module
    ref = encoder_reference(params, x, mask)
    max_err = float(jnp.max(jnp.abs(out - ref)))
    assert max_err < 5e-2, f"mismatch vs reference: max abs err = {max_err}"

    print("KERNEL_OK")
</pallas_src>

<mosaic_0001>
module attributes {stable_mosaic.version = 11 : i64} {
  func.func @_ln_qkv_kernel(%arg0: i32, %arg1: memref<16x32xf32, #tpu.memory_space<vmem>>, %arg2: memref<1x32xf32, #tpu.memory_space<vmem>>, %arg3: memref<1x32xf32, #tpu.memory_space<vmem>>, %arg4: memref<32x96xf32, #tpu.memory_space<vmem>>, %arg5: memref<1x96xf32, #tpu.memory_space<vmem>>, %arg6: memref<16x32xf32, #tpu.memory_space<vmem>>, %arg7: memref<16x32xf32, #tpu.memory_space<vmem>>, %arg8: memref<16x32xf32, #tpu.memory_space<vmem>>) attributes {dimension_semantics = [#tpu.dimension_semantics<parallel>], iteration_bounds = array<i64: 1>, scalar_prefetch = 0 : i64, scratch_operands = 0 : i64, tpu.core_type = #tpu.core_type<tc>, window_params = [{transform_indices = @transform_0, window_bounds = array<i64: 16, 32>}, {pipeline_mode = #tpu.pipeline_mode<synchronous>, transform_indices = @transform_1, window_bounds = array<i64: 1, 32>}, {pipeline_mode = #tpu.pipeline_mode<synchronous>, transform_indices = @transform_2, window_bounds = array<i64: 1, 32>}, {pipeline_mode = #tpu.pipeline_mode<synchronous>, transform_indices = @transform_3, window_bounds = array<i64: 32, 96>}, {pipeline_mode = #tpu.pipeline_mode<synchronous>, transform_indices = @transform_4, window_bounds = array<i64: 1, 96>}, {transform_indices = @transform_5, window_bounds = array<i64: 16, 32>}, {transform_indices = @transform_6, window_bounds = array<i64: 16, 32>}, {transform_indices = @transform_7, window_bounds = array<i64: 16, 32>}]} {
    %c0 = arith.constant 0 : index
    %c0_0 = arith.constant 0 : index
    %0 = vector.load %arg1[%c0, %c0_0] : memref<16x32xf32, #tpu.memory_space<vmem>>, vector<16x32xf32>
    %c0_1 = arith.constant 0 : index
    %c0_2 = arith.constant 0 : index
    %1 = vector.load %arg2[%c0_1, %c0_2] : memref<1x32xf32, #tpu.memory_space<vmem>>, vector<1x32xf32>
    %c0_3 = arith.constant 0 : index
    %c0_4 = arith.constant 0 : index
    %2 = vector.load %arg3[%c0_3, %c0_4] : memref<1x32xf32, #tpu.memory_space<vmem>>, vector<1x32xf32>
    %cst = arith.constant dense<0.000000e+00> : vector<16xf32>
    %3 = vector.multi_reduction <add>, %0, %cst [1] : vector<16x32xf32> to vector<16xf32>
    %4 = vector.shape_cast %3 : vector<16xf32> to vector<16x1xf32>
    %cst_5 = arith.constant 3.200000e+01 : f32
    %5 = vector.broadcast %cst_5 : f32 to vector<16x1xf32>
    %6 = arith.divf %4, %5 : vector<16x1xf32>
    %7 = vector.broadcast %6 : vector<16x1xf32> to vector<16x32xf32>
    %8 = arith.subf %0, %7 : vector<16x32xf32>
    %9 = arith.mulf %8, %8 : vector<16x32xf32>
    %cst_6 = arith.constant dense<0.000000e+00> : vector<16xf32>
    %10 = vector.multi_reduction <add>, %9, %cst_6 [1] : vector<16x32xf32> to vector<16xf32>
    %11 = vector.shape_cast %10 : vector<16xf32> to vector<16x1xf32>
    %cst_7 = arith.constant 0.0322580636 : f32
    %12 = vector.broadcast %cst_7 : f32 to vector<16x1xf32>
    %13 = arith.mulf %11, %12 : vector<16x1xf32>
    %14 = vector.broadcast %1 : vector<1x32xf32> to vector<16x32xf32>
    %15 = arith.mulf %14, %8 : vector<16x32xf32>
    %16 = math.sqrt %13 : vector<16x1xf32>
    %cst_8 = arith.constant 9.99999997E-7 : f32
    %17 = vector.broadcast %cst_8 : f32 to vector<16x1xf32>
    %18 = arith.addf %16, %17 : vector<16x1xf32>
    %19 = vector.broadcast %18 : vector<16x1xf32> to vector<16x32xf32>
    %20 = arith.divf %15, %19 : vector<16x32xf32>
    %21 = vector.broadcast %2 : vector<1x32xf32> to vector<16x32xf32>
    %22 = arith.addf %20, %21 : vector<16x32xf32>
    %c0_9 = arith.constant 0 : index
    %c0_10 = arith.constant 0 : index
    %23 = vector.load %arg4[%c0_9, %c0_10] : memref<32x96xf32, #tpu.memory_space<vmem>>, vector<32x96xf32>
    %cst_11 = arith.constant dense<0.000000e+00> : vector<16x96xf32>
    %24 = tpu.matmul %22, %23, %cst_11 {dimension_numbers = #tpu.dot_dimension_numbers<[1], [0], [0], [1], [0, 0, 1, 1], [], []>} : vector<16x32xf32>, vector<32x96xf32>, vector<16x96xf32> -> vector<16x96xf32>
    %c0_12 = arith.constant 0 : index
    %c0_13 = arith.constant 0 : index
    %25 = vector.load %arg5[%c0_12, %c0_13] : memref<1x96xf32, #tpu.memory_space<vmem>>, vector<1x96xf32>
    %26 = vector.broadcast %25 : vector<1x96xf32> to vector<16x96xf32>
    %27 = arith.addf %24, %26 : vector<16x96xf32>
    %28 = vector.extract_strided_slice %27 {offsets = [0, 0], sizes = [16, 32], strides = [1, 1]} : vector<16x96xf32> to vector<16x32xf32>
    %c0_14 = arith.constant 0 : index
    %c0_15 = arith.constant 0 : index
    %29 = vector.load %arg6[%c0_14, %c0_15] : memref<16x32xf32, #tpu.memory_space<vmem>>, vector<16x32xf32>
    tpu.vector_store %arg6[%c0_14, %c0_15], %28 {strides = array<i32>} : memref<16x32xf32, #tpu.memory_space<vmem>>, vector<16x32xf32>,
    %30 = vector.extract_strided_slice %27 {offsets = [0, 32], sizes = [16, 32], strides = [1, 1]} : vector<16x96xf32> to vector<16x32xf32>
    %c0_16 = arith.constant 0 : index
    %c0_17 = arith.constant 0 : index
    %31 = vector.load %arg7[%c0_16, %c0_17] : memref<16x32xf32, #tpu.memory_space<vmem>>, vector<16x32xf32>
    tpu.vector_store %arg7[%c0_16, %c0_17], %30 {strides = array<i32>} : memref<16x32xf32, #tpu.memory_space<vmem>>, vector<16x32xf32>,
    %32 = vector.extract_strided_slice %27 {offsets = [0, 64], sizes = [16, 32], strides = [1, 1]} : vector<16x96xf32> to vector<16x32xf32>
    %c0_18 = arith.constant 0 : index
    %c0_19 = arith.constant 0 : index
    %33 = vector.load %arg8[%c0_18, %c0_19] : memref<16x32xf32, #tpu.memory_space<vmem>>, vector<16x32xf32>
    tpu.vector_store %arg8[%c0_18, %c0_19], %32 {strides = array<i32>} : memref<16x32xf32, #tpu.memory_space<vmem>>, vector<16x32xf32>,
    return
  }
  func.func @transform_0(%arg0: i32) -> (i32, i32) {
    %c0_i32 = arith.constant 0 : i32
    %c0_i32_0 = arith.constant 0 : i32
    return %arg0, %c0_i32 : i32, i32
  }
  func.func @transform_1(%arg0: i32) -> (i32, i32) {
    %c0_i32 = arith.constant 0 : i32
    %c0_i32_0 = arith.constant 0 : i32
    %c0_i32_1 = arith.constant 0 : i32
    return %c0_i32, %c0_i32_0 : i32, i32
  }
  func.func @transform_2(%arg0: i32) -> (i32, i32) {
    %c0_i32 = arith.constant 0 : i32
    %c0_i32_0 = arith.constant 0 : i32
    %c0_i32_1 = arith.constant 0 : i32
    return %c0_i32, %c0_i32_0 : i32, i32
  }
  func.func @transform_3(%arg0: i32) -> (i32, i32) {
    %c0_i32 = arith.constant 0 : i32
    %c0_i32_0 = arith.constant 0 : i32
    %c0_i32_1 = arith.constant 0 : i32
    return %c0_i32, %c0_i32_0 : i32, i32
  }
  func.func @transform_4(%arg0: i32) -> (i32, i32) {
    %c0_i32 = arith.constant 0 : i32
    %c0_i32_0 = arith.constant 0 : i32
    %c0_i32_1 = arith.constant 0 : i32
    return %c0_i32, %c0_i32_0 : i32, i32
  }
  func.func @transform_5(%arg0: i32) -> (i32, i32) {
    %c0_i32 = arith.constant 0 : i32
    %c0_i32_0 = arith.constant 0 : i32
    return %arg0, %c0_i32 : i32, i32
  }
  func.func @transform_6(%arg0: i32) -> (i32, i32) {
    %c0_i32 = arith.constant 0 : i32
    %c0_i32_0 = arith.constant 0 : i32
    return %arg0, %c0_i32 : i32, i32
  }
  func.func @transform_7(%arg0: i32) -> (i32, i32) {
    %c0_i32 = arith.constant 0 : i32
    %c0_i32_0 = arith.constant 0 : i32
    return %arg0, %c0_i32 : i32, i32
  }
}

</mosaic_0001>

<bundles_post_ra>
// kernel: tpu_custom_call.1
= control target key start
LH: loop header
LB: loop body
LE: loop exit
PB: predicated region body
PF: predicated region fallthrough
CT: control target
= control target key end

     0   :  { %13 = vsyncpa [#allocation3], 0  ;;  %s586_s0 = inlined_call_operand.hbm [shape: f32[16,32], index: 0, kind: input, shape index: {}]   ;;  %s587_s1 = inlined_call_operand.vmem [shape: f32[1,32], index: 1, kind: input, shape index: {}]   ;;  %s588_s2 = inlined_call_operand.vmem [shape: f32[1,32], index: 2, kind: input, shape index: {}]   ;;  %s589_s3 = inlined_call_operand.hbm [shape: f32[32,96], index: 3, kind: input, shape index: {}]   ;;  %s590_s4 = inlined_call_operand.vmem [shape: f32[1,96], index: 4, kind: input, shape index: {}]   ;;  %s591_s5 = inlined_call_operand.hbm [shape: f32[16,32], index: 5, kind: output, shape index: {0}]   ;;  %s592_s6 = inlined_call_operand.hbm [shape: f32[16,32], index: 6, kind: output, shape index: {1}]   ;;  %s593_s7 = inlined_call_operand.hbm [shape: f32[16,32], index: 7, kind: output, shape index: {2}]  }
   0x1   :  { %14 = vsyncpa [#allocation6], 0 }
   0x2   :  { %15 = vsyncpa [#allocation4], 0 }
   0x3   :  { %16 = vsyncpa [#allocation9], 0  ;;  %s441_s24 = smov [#allocation2]   ;;  %s323_s28 = scalar_lea.hbm %s586_s0, 256 }
   0x4   :  { %s22_s25 = sshll.u32 %s441_s24, 4  ;;  %p324_p0 = scmp.ne.s32.totalorder %s586_s0, %s323_s28  ;;  %s23_s25 = int_to_ptr.vmem [resolvable:$true] %s22_s25 }
   0x5   :  { %p327_p1 = scmp.lt.u32.totalorder %s323_s28, %s586_s0 }
   0x7   :  { %p329_p2 = pnand %p327_p1, %p324_p0 }
   0x9   :  { %332 = shalt.err (!%p329_p2)
}
   0xa   :  { %s333_s10 = scalar_lea.vmem %s23_s25, 256  ;;  %p338_p4 = scmp.lt.s32.totalorder %s23_s25, %s23_s25 }
   0xb   :  { %p334_p3 = scmp.ne.s32.totalorder %s23_s25, %s333_s10  ;;  %p339_p5 = scmp.lt.s32.totalorder %s333_s10, %s333_s10 }
   0xd   :  { %p340_p6 = por %p339_p5, %p338_p4 }
   0xf   :  { %p341_p7 = pnand %p340_p6, %p334_p3 }
  0x11   :  { %344 = shalt.err (!%p341_p7)
}
  0x12   :  { %s442_s11 = smov 128   ;;  %s443_s12 = smov 8  }
  0x13   :  { %28 = dma.hbm_to_vmem [thread:$0]  %s586_s0, 256, %s23_s25, [#allocation3], %s442_s11, %s442_s11, %s443_s12  }
  0x14   :  { %s444_s15 = smov [#allocation5]   ;;  %s345_s19 = scalar_lea.hbm %s589_s3, 512 }
  0x15   :  { %s38_s16 = sshll.u32 %s444_s15, 4  ;;  %p346_p8 = scmp.ne.s32.totalorder %s589_s3, %s345_s19  ;;  %s39_s16 = int_to_ptr.vmem [resolvable:$true] %s38_s16 }
  0x16   :  { %p349_p9 = scmp.lt.u32.totalorder %s345_s19, %s589_s3 }
  0x18   :  { %p351_p10 = pnand %p349_p9, %p346_p8 }
  0x1a   :  { %354 = shalt.err (!%p351_p10)
}
  0x1b   :  { %s355_s24 = scalar_lea.vmem %s39_s16, 512  ;;  %p360_p12 = scmp.lt.s32.totalorder %s39_s16, %s39_s16 }
  0x1c   :  { %p356_p11 = scmp.ne.s32.totalorder %s39_s16, %s355_s24  ;;  %p361_p13 = scmp.lt.s32.totalorder %s355_s24, %s355_s24 }
  0x1e   :  { %p362_p0 = por %p361_p13, %p360_p12 }
  0x20   :  { %p363_p1 = pnand %p362_p0, %p356_p11 }
  0x22   :  { %366 = shalt.err (!%p363_p1)
}
  0x23   :  { %44 = dma.hbm_to_vmem [thread:$0]  %s589_s3, 512, %s39_s16, [#allocation6], %s442_s11, %s442_s11, %s443_s12  }
  0x24   :  { %433 = dma.done.wait [#allocation3], 256  }
  0x25   :  { %434 = vsyncadd [#allocation3], 4294967040 }
  0x26   :  { %435 = dma.done.wait [#allocation6], 512  }
  0x27   :  { %436 = vsyncadd [#allocation6], 4294966784  ;;  %vm57_vm0 = vcmask 261120   ;;  %v53_v0 = vld [vmem:[#allocation2] sm:$0xff]  ;;  %v54_v1 = vld [vmem:[#allocation2 + $0x8] sm:$0xff] }
  0x28   :  { %v58_v2 = vsel %vm57_vm0, %v53_v0, 0.0  ;;  %v61_v3 = vsel %vm57_vm0, %v54_v1, 0.0  ;;  %v115_v14 = vld [vmem:[#allocation5] sm:$0xff]  ;;  %v116_v15 = vld [vmem:[#allocation5 + $0x8] sm:$0xff]  ;;  %v117_v16 = vld [vmem:[#allocation5 + $0x10] sm:$0xff] }
  0x29   :  { %59 = vadd.xlane.f32.xlu0 %v58_v2  ;;  %v298_v17 = vpack.c.bf16 %v116_v15, %v115_v14  ;;  %v118_v18 = vld [vmem:[#allocation5 + $0x18] sm:$0xff]  ;;  %v276_v36 = vld [vmem:[%s587_s1] ss:$0 sm:$0xff]  ;;  %s445_s1 = smov [#allocation7]  }
  0x2a   :  { %v302_v19 = vpack.c.bf16 %v118_v18, %v117_v16  ;;  %v277_v39 = vld [vmem:[%s588_s2] ss:$0 sm:$0xff]  ;;  %s232_s8 = sshll.u32 %s445_s1, 4  ;;  %s446_s2 = smov 96   ;;  %s233_s8 = int_to_ptr.vmem [resolvable:$true] %s232_s8 }
  0x2b   :  { %299 = vmatprep.subr.bf16.mxu0 %v298_v17  ;;  %v278_v46 = vld [vmem:[%s590_s4] ss:$0 sm:$0xff]  ;;  %s367_s9 = scalar_lea.vmem %s233_s8, 256  ;;  %p372_p3 = scmp.lt.s32.totalorder %s233_s8, %s233_s8 }
  0x2c   :  { %301 = vmatpush3.bf16.msra.mxu0 %v298_v17  ;;  %p368_p2 = scmp.ne.s32.totalorder %s233_s8, %s367_s9  ;;  %p373_p4 = scmp.lt.s32.totalorder %s367_s9, %s367_s9 }
  0x2d   :  { %62 = vadd.xlane.f32.xlu0 %v61_v3  ;;  %303 = vmatprep.subr.bf16.mxu0 %v302_v19 }
  0x2e   :  { %p374_p5 = por %p373_p4, %p372_p3 }
  0x30   :  { %305 = vmatpush3.bf16.msra.mxu0 %v302_v19  ;;  %p375_p6 = pnand %p374_p5, %p368_p2 }
  0xb6   :  { %v60_v4 = vpop.xlane.xlu0 %59 }
  0xb7   :  { %v65_v5 = vmul.f32 0.03125, %v60_v4 }
  0xb9   :  { %v67_v6 = vsub.f32 %v53_v0, %v65_v5 }
  0xba   :  { %v63_v7 = vpop.xlane.xlu0 %62 }
  0xbb   :  { %v66_v8 = vmul.f32 0.03125, %v63_v7  ;;  %v69_v9 = vmul.f32 %v67_v6, %v67_v6  ;;  %v85_v37 = vmul.f32 %v276_v36, %v67_v6 }
  0xbd   :  { %v68_v10 = vsub.f32 %v54_v1, %v66_v8  ;;  %v71_v11 = vsel %vm57_vm0, %v69_v9, 0.0 }
  0xbe   :  { %72 = vadd.xlane.f32.xlu1 %v71_v11 }
  0xbf   :  { %v70_v12 = vmul.f32 %v68_v10, %v68_v10  ;;  %v86_v41 = vmul.f32 %v276_v36, %v68_v10 }
  0xc1   :  { %v74_v13 = vsel %vm57_vm0, %v70_v12, 0.0 }
  0xc2   :  { %75 = vadd.xlane.f32.xlu1 %v74_v13 }
 0x14b   :  { %v73_v20 = vpop.xlane.xlu1 %72 }
 0x14c   :  { %v77_v21 = vmul.f32 0.032258064, %v73_v20 }
 0x14e   :  { %315 = vrsqrt.f32 %v77_v21  ;;  %vm89_vm1 = vcmp.eq.f32.partialorder %v77_v21, inf  ;;  %v92_v26 = vand.u32 2147483648, %v77_v21  ;;  %vm91_vm2 = vcmp.eq.f32.partialorder %v77_v21, 0.0 }
 0x14f   :  { %v76_v22 = vpop.xlane.xlu1 %75 }
 0x150   :  { %v78_v23 = vmul.f32 0.032258064, %v76_v22 }
 0x152   :  { %317 = vrsqrt.f32 %v78_v23  ;;  %vm96_vm3 = vcmp.eq.f32.partialorder %v78_v23, inf  ;;  %v99_v32 = vand.u32 2147483648, %v78_v23  ;;  %vm98_vm4 = vcmp.eq.f32.partialorder %v78_v23, 0.0 }
 0x158   :  { %v316_v24 = vpop.eup %315 }
 0x159   :  { %v88_v25 = vmul.f32 %v316_v24, %v77_v21 }
 0x15b   :  { %v90_v27 = vsel %vm89_vm1, %v77_v21, %v88_v25 }
 0x15c   :  { %v318_v28 = vpop.eup %317  ;;  %v93_v29 = vsel %vm91_vm2, %v92_v26, %v90_v27 }
 0x15d   :  { %v95_v30 = vmul.f32 %v318_v28, %v78_v23  ;;  %v101_v31 = vadd.f32 1e-06, %v93_v29 }
 0x15f   :  { %v97_v33 = vsel %vm96_vm3, %v78_v23, %v95_v30  ;;  %319 = vrcp.f32 %v101_v31 }
 0x160   :  { %v100_v34 = vsel %vm98_vm4, %v99_v32, %v97_v33 }
 0x161   :  { %v102_v35 = vadd.f32 1e-06, %v100_v34 }
 0x163   :  { %321 = vrcp.f32 %v102_v35 }
 0x169   :  { %v320_v38 = vpop.eup %319 }
 0x16a   :  { %v104_v40 = vmul.f32 %v320_v38, %v85_v37 }
 0x16c   :  { %v113_v42 = vadd.f32 %v277_v39, %v104_v40 }
 0x16d   :  { %v322_v43 = vpop.eup %321 }
 0x16e   :  { %v106_v44 = vmul.f32 %v322_v43, %v86_v41  ;;  %295 = vmatprep.mubr.msk.f32.mxu0 %vm57_vm0, %v113_v42 }
 0x170   :  { %v114_v45 = vadd.f32 %v277_v39, %v106_v44 }
 0x172   :  { %296 = vmatmul.mubr.msk.f32.vlgmr.msra.gmra.mrb[0].mxu0 %vm57_vm0, %v114_v45 }
 0x245   :  { %v297_v47 = vpop.f32.mrb[0].mxu0 }
 0x246   :  { %v204_v48 = vadd.f32 %v297_v47, %v278_v46  ;;  %v198_v49 = vpop.f32.mrb[1].mxu0 }
 0x247   :  { %v199_v50 = vadd.f32 %v278_v46, %v198_v49 }
 0x248   :  { %208 = vst.msk [vmem:[#allocation7 + $0x8] sm:$0xff] %vm57_vm0, %v204_v48  ;;  %213 = vrot.lane.b32.xlu1 %v204_v48, %s446_s2 }
 0x249   :  { %207 = vst.msk [vmem:[#allocation7] sm:$0xff] %vm57_vm0, %v199_v50  ;;  %211 = vrot.lane.b32.xlu0 %v199_v50, %s446_s2 }
 0x24a   :  { %378 = shalt.err (!%p375_p6)
}
 0x24b   :  { %s379_s13 = scalar_lea.hbm %s591_s5, 256 }
 0x24c   :  { %p380_p7 = scmp.ne.s32.totalorder %s591_s5, %s379_s13  ;;  %p383_p8 = scmp.lt.u32.totalorder %s379_s13, %s591_s5 }
 0x24e   :  { %p385_p9 = pnand %p383_p8, %p380_p7 }
 0x250   :  { %388 = shalt.err (!%p385_p9)
}
 0x251   :  { %238 = dma.vmem_to_hbm [thread:$0]  %s233_s8, 256, %s591_s5, [#allocation4], %s442_s11, %s442_s11, %s443_s12  }
 0x252   :  { %s447_s20 = smov 64   ;;  %s448_s21 = smov [#allocation8]  }
 0x253   :  { %219 = vrot.lane.b32.xlu1 %v199_v50, %s447_s20  ;;  %s244_s22 = sshll.u32 %s448_s21, 4  ;;  %s245_s22 = int_to_ptr.vmem [resolvable:$true] %s244_s22 }
 0x254   :  { %s389_s23 = scalar_lea.vmem %s245_s22, 256  ;;  %p394_p11 = scmp.lt.s32.totalorder %s245_s22, %s245_s22 }
 0x255   :  { %p390_p10 = scmp.ne.s32.totalorder %s245_s22, %s389_s23  ;;  %p395_p12 = scmp.lt.s32.totalorder %s389_s23, %s389_s23 }
 0x257   :  { %221 = vrot.lane.b32.xlu1 %v204_v48, %s447_s20  ;;  %p396_p13 = por %p395_p12, %p394_p11 }
 0x259   :  { %p397_p0 = pnand %p396_p13, %p390_p10 }
 0x2ba   :  { %v214_v51 = vpop.permute.xlu1 %213 }
 0x2bb   :  { %218 = vst.msk [vmem:[#allocation8 + $0x8] sm:$0xff] %vm57_vm0, %v214_v51  ;;  %v212_v52 = vpop.permute.xlu0 %211 }
 0x2bc   :  { %217 = vst.msk [vmem:[#allocation8] sm:$0xff] %vm57_vm0, %v212_v52 }
 0x2bd   :  { %400 = shalt.err (!%p397_p0)
}
 0x2be   :  { %s401_s0 = scalar_lea.hbm %s592_s6, 256 }
 0x2bf   :  { %p402_p1 = scmp.ne.s32.totalorder %s592_s6, %s401_s0  ;;  %p405_p2 = scmp.lt.u32.totalorder %s401_s0, %s592_s6 }
 0x2c1   :  { %p407_p3 = pnand %p405_p2, %p402_p1 }
 0x2c3   :  { %410 = shalt.err (!%p407_p3)
}
 0x2c4   :  { %250 = dma.vmem_to_hbm [thread:$0]  %s245_s22, 256, %s592_s6, [#allocation9], %s442_s11, %s442_s11, %s443_s12  }
 0x2c5   :  { %v220_v53 = vpop.permute.xlu1 %219  ;;  %s449_s30 = smov [#allocation10]  }
 0x2c6   :  { %s256_s1 = sshll.u32 %s449_s30, 4  ;;  %225 = vst.msk [vmem:[#allocation10] sm:$0xff] %vm57_vm0, %v220_v53  ;;  %s257_s1 = int_to_ptr.vmem [resolvable:$true] %s256_s1 }
 0x2c7   :  { %s411_s8 = scalar_lea.vmem %s257_s1, 256  ;;  %p416_p5 = scmp.lt.s32.totalorder %s257_s1, %s257_s1 }
 0x2c8   :  { %p412_p4 = scmp.ne.s32.totalorder %s257_s1, %s411_s8  ;;  %p417_p6 = scmp.lt.s32.totalorder %s411_s8, %s411_s8 }
 0x2c9   :  { %v222_v54 = vpop.permute.xlu1 %221 }
 0x2ca   :  { %226 = vst.msk [vmem:[#allocation10 + $0x8] sm:$0xff] %vm57_vm0, %v222_v54  ;;  %p418_p7 = por %p417_p6, %p416_p5 }
 0x2cc   :  { %p419_p8 = pnand %p418_p7, %p412_p4 }
 0x2ce   :  { %422 = shalt.err (!%p419_p8)
}
 0x2cf   :  { %s423_s6 = scalar_lea.hbm %s593_s7, 256 }
 0x2d0   :  { %p424_p9 = scmp.ne.s32.totalorder %s593_s7, %s423_s6  ;;  %p427_p10 = scmp.lt.u32.totalorder %s423_s6, %s593_s7 }
 0x2d2   :  { %p429_p11 = pnand %p427_p10, %p424_p9 }
 0x2d4   :  { %432 = shalt.err (!%p429_p11)
}
 0x2d5   :  { %262 = dma.vmem_to_hbm [thread:$0]  %s257_s1, 256, %s593_s7, [#allocation9], %s442_s11, %s442_s11, %s443_s12  }
 0x2d6   :  { %437 = dma.done.wait [#allocation4], 256  }
 0x2d7   :  { %438 = vsyncadd [#allocation4], 4294967040 }
 0x2d8   :  { %439 = dma.done.wait [#allocation9], 512  }
 0x2d9   :  { %440 = vsyncadd [#allocation9], 4294966784 }
 0x2da   :  { %272 = vsyncpa [#allocation3], 1 }
 0x2db   :  { %273 = vsyncpa [#allocation6], 1 }
 0x2dc   :  { %274 = vsyncpa [#allocation4], 1 }
 0x2dd   :  { %275 = vsyncpa [#allocation9], 1 }

</bundles_post_ra>
